<compile_context>
chip_gen: v7x
topology: tpu7x:2x2x1
jax: 0.10.0
libtpu: 0.0.40
codegen_flags: <defaults>
</compile_context>

<pallas_src>
import jax
import jax.numpy as jnp
from jax import lax
from jax.experimental import pallas as pl
from jax.experimental.pallas import tpu as pltpu


# Double-buffered VMEM budget for the mask-compare pass (f32 in + int8 out).
# ~50 MiB of block buffers fits v7x's 64 MiB physical VMEM with headroom and is
# well under v5e/v6e's 128 MiB once the scoped limit is raised.
_MASK_VMEM_BUDGET = 50 * 1024 * 1024
_MASK_VMEM_LIMIT = 56 * 1024 * 1024


def linear_thresh_kernel(x_ref, w_ref, b_ref, out_ref, thr_ref):
    # LINEAR PASS: out = x @ W^T + b (single full block; MXU, f32 accumulation).
    # w is (OUT, IN) like nn.Linear; contract IN (dim 1) of both operands.
    # Any implied in-kernel transpose of W is ~1 MiB at real size -> negligible
    # next to the ~625 MB mask pass, so keep the nn.Linear parameter layout.
    out = lax.dot_general(
        x_ref[...], w_ref[...],
        dimension_numbers=(((1,), (1,)), ((), ())),
        preferred_element_type=jnp.float32,
        precision=lax.Precision.HIGHEST)
    out = out + b_ref[...]
    out_ref[...] = out.astype(out_ref.dtype)
    # threshold = out.sum(axis=1).mean() == sum(out) / B.
    # NOTE: only valid while this call stays gridless (single full block); if
    # the linear is ever tiled this needs a P3 accumulator + final divide.
    thr_ref[0, 0] = jnp.sum(out) / jnp.float32(out.shape[0])


def mask_kernel(thr_ref, mask_ref, flags_ref):
    # MASK INDICES hot path: elementwise compare of a (tile_rows, cols) slab.
    t = thr_ref[0, 0]                                   # scalar read from SMEM
    flags_ref[...] = (mask_ref[...] > t).astype(jnp.int8)
    # TODO(synk): bit-packing flags (8/byte) would cut write traffic ~8x but
    # requires owning the index decode; kept 1 int8/elem to keep jnp.nonzero.


def _plan_mask_view(shape, budget_bytes=_MASK_VMEM_BUDGET):
    """Pick a lane-dense 2D view + row tile for the mask compare pass.

    Returns ((rows, cols), tile_rows) with rows * cols == prod(shape),
    rows % tile_rows == 0 (no ragged last block), tile_rows a multiple of 32
    (or 8) for legal sublane blocks and dense int8 packing, cols equal to the
    full lane dim of the view, and a double-buffered f32-in + int8-out block
    footprint within budget_bytes.  Returns None if no such factorization
    exists (caller falls back to leading-dim tiling of the 3D shape).
    """
    n = 1
    for d in shape:
        n *= int(d)
    if n <= 0:
        return None
    max_block_elems = budget_bytes // (2 * (4 + 1))     # 2 buffers, 5 B/elem
    for tile_rows in (32, 8):
        if n % tile_rows:
            continue
        # Largest divisor T of n with tile_rows | T and T <= max_block_elems.
        best_t = 0
        i = 1
        while i * i <= n:
            if n % i == 0:
                for t in (i, n // i):
                    if t <= max_block_elems and t % tile_rows == 0 and t > best_t:
                        best_t = t
            i += 1
        if best_t:
            cols = best_t // tile_rows
            rows = n // cols
            return (rows, cols), tile_rows
    return None


def my_module_forward(x, w, b, mask):
    """x: (B, IN) f32, w: (OUT, IN) f32, b: (OUT,) f32, mask: (D0, D1, D2) f32.

    Returns (out, hi_idx) matching MyModule.forward:
      out    = x @ w.T + b
      thr    = out.sum(axis=1).mean()
      hi_idx = nonzero(mask > thr)   # tuple of 3 index arrays (as_tuple=True)
    """
    B, IN = x.shape
    OUT = w.shape[0]
    b2 = b.reshape(1, OUT)

    lin_cost = pl.CostEstimate(
        flops=int(2 * B * IN * OUT),
        transcendentals=0,
        bytes_accessed=int(4 * (B * IN + OUT * IN + OUT + B * OUT + 1)))

    out, thr = pl.pallas_call(
        linear_thresh_kernel,
        in_specs=[pl.BlockSpec(memory_space=pltpu.MemorySpace.VMEM),
                  pl.BlockSpec(memory_space=pltpu.MemorySpace.VMEM),
                  pl.BlockSpec(memory_space=pltpu.MemorySpace.VMEM)],
        out_specs=(pl.BlockSpec(memory_space=pltpu.MemorySpace.VMEM),
                   pl.BlockSpec(memory_space=pltpu.MemorySpace.SMEM)),
        out_shape=(jax.ShapeDtypeStruct((B, OUT), x.dtype),
                   jax.ShapeDtypeStruct((1, 1), jnp.float32)),
        cost_estimate=lin_cost,
    )(x, w, b2)

    mask_shape = mask.shape
    n = int(mask.size)
    mask_cost = pl.CostEstimate(flops=n, transcendentals=0,
                                bytes_accessed=5 * n)

    plan = _plan_mask_view(mask_shape)
    if plan is not None:
        (rows, cols), tile_rows = plan
        mask_view = mask.reshape(rows, cols)        # metadata-only (contiguous)
        grid = (rows // tile_rows,)
        in_block = pl.BlockSpec((tile_rows, cols), lambda i: (i, 0))
        out_block = pl.BlockSpec((tile_rows, cols), lambda i: (i, 0))
        flags_shape = (rows, cols)
    else:
        # Fallback: leading-dim tiling of the original 3D shape (always legal:
        # last two block dims equal the full array dims).
        D0, D1, D2 = mask_shape
        row_bytes = D1 * D2 * (4 + 1)
        max_rows = max(1, _MASK_VMEM_BUDGET // (2 * row_bytes))
        tile_rows = 1
        for d in range(1, D0 + 1):
            if D0 % d == 0 and d <= max_rows:
                tile_rows = d
        mask_view = mask
        grid = (D0 // tile_rows,)
        in_block = pl.BlockSpec((tile_rows, D1, D2), lambda i: (i, 0, 0))
        out_block = pl.BlockSpec((tile_rows, D1, D2), lambda i: (i, 0, 0))
        flags_shape = (D0, D1, D2)

    flags = pl.pallas_call(
        mask_kernel,
        grid=grid,
        in_specs=[pl.BlockSpec(memory_space=pltpu.MemorySpace.SMEM),  # threshold
                  in_block],
        out_specs=out_block,
        out_shape=jax.ShapeDtypeStruct(flags_shape, jnp.int8),
        compiler_params=pltpu.CompilerParams(
            dimension_semantics=("parallel",),
            vmem_limit_bytes=_MASK_VMEM_LIMIT),
        cost_estimate=mask_cost,
    )(thr, mask_view)

    flags = flags.reshape(mask_shape)               # metadata-only
    # TODO(synk): nonzero has a data-dependent output shape -> no Pallas
    # equivalent; index compaction stays in plain JAX (device->host sync).
    hi_idx = jnp.nonzero(flags)                     # tuple of 3 index arrays
    return out, hi_idx


if __name__ == "__main__":
    key = jax.random.PRNGKey(0)
    k_x, k_m, k_w, k_b = jax.random.split(key, 4)

    B, IN, OUT = 16, 32, 64          # small stand-ins for (128, 500) / Linear(500, 500)
    D0, D1, D2 = 16, 16, 128         # small stand-in for the (500, 500, 500) mask

    x = jax.random.uniform(k_x, (B, IN), dtype=jnp.float32)
    mask = jax.random.uniform(k_m, (D0, D1, D2), dtype=jnp.float32)

    # Deterministic Linear parameters (same shapes as nn.Linear(IN, OUT, bias=True))
    bound = 1.0 / (IN ** 0.5)
    w = jax.random.uniform(k_w, (OUT, IN), minval=-bound, maxval=bound,
                           dtype=jnp.float32)
    b = jax.random.uniform(k_b, (OUT,), minval=-bound, maxval=bound,
                           dtype=jnp.float32)

    out, hi_idx = my_module_forward(x, w, b, mask)
    jax.block_until_ready((out, hi_idx))

    # Sanity check against a pure-JAX reference.
    ref_out = jnp.dot(x, w.T, precision=lax.Precision.HIGHEST) + b
    ref_thr = ref_out.sum(axis=1).mean()
    assert jnp.allclose(out, ref_out, atol=1e-4, rtol=1e-4)
    assert len(hi_idx) == 3

    # Index check tolerant to last-ulp differences between the in-kernel
    # threshold reduction and the reference reduction (avoids flaky boundary
    # flips for mask values within eps of the threshold).
    sel = jnp.zeros(mask.shape, dtype=bool).at[hi_idx].set(True)
    eps = 1e-5
    ok = jnp.where(sel, mask > ref_thr - eps, mask <= ref_thr + eps)
    assert bool(jnp.all(ok))

    print("KERNEL_OK")
</pallas_src>

<mosaic_0001>
module attributes {stable_mosaic.version = 11 : i64} {
  func.func @linear_thresh_kernel(%arg0: memref<16x32xf32, #tpu.memory_space<vmem>>, %arg1: memref<64x32xf32, #tpu.memory_space<vmem>>, %arg2: memref<1x64xf32, #tpu.memory_space<vmem>>, %arg3: memref<16x64xf32, #tpu.memory_space<vmem>>, %arg4: memref<1x1xf32, #tpu.memory_space<smem>>) attributes {dimension_semantics = [], scalar_prefetch = 0 : i64, scratch_operands = 0 : i64, tpu.core_type = #tpu.core_type<tc>} {
    %c0 = arith.constant 0 : index
    %c0_0 = arith.constant 0 : index
    %0 = vector.load %arg0[%c0, %c0_0] : memref<16x32xf32, #tpu.memory_space<vmem>>, vector<16x32xf32>
    %c0_1 = arith.constant 0 : index
    %c0_2 = arith.constant 0 : index
    %1 = vector.load %arg1[%c0_1, %c0_2] : memref<64x32xf32, #tpu.memory_space<vmem>>, vector<64x32xf32>
    %cst = arith.constant dense<0.000000e+00> : vector<16x64xf32>
    %2 = tpu.matmul %0, %1, %cst {dimension_numbers = #tpu.dot_dimension_numbers<[1], [1], [0], [0], [0, 0, 1, 0], [], []>, precision = #tpu.contract_precision<fp32>} : vector<16x32xf32>, vector<64x32xf32>, vector<16x64xf32> -> vector<16x64xf32>
    %c0_3 = arith.constant 0 : index
    %c0_4 = arith.constant 0 : index
    %3 = vector.load %arg2[%c0_3, %c0_4] : memref<1x64xf32, #tpu.memory_space<vmem>>, vector<1x64xf32>
    %4 = vector.broadcast %3 : vector<1x64xf32> to vector<16x64xf32>
    %5 = arith.addf %2, %4 : vector<16x64xf32>
    %c0_5 = arith.constant 0 : index
    %c0_6 = arith.constant 0 : index
    %6 = vector.load %arg3[%c0_5, %c0_6] : memref<16x64xf32, #tpu.memory_space<vmem>>, vector<16x64xf32>
    tpu.vector_store %arg3[%c0_5, %c0_6], %5 {strides = array<i32>} : memref<16x64xf32, #tpu.memory_space<vmem>>, vector<16x64xf32>,
    %7 = vector.shape_cast %5 : vector<16x64xf32> to vector<1x16x64xf32>
    %cst_7 = arith.constant dense<0.000000e+00> : vector<1xf32>
    %8 = vector.multi_reduction <add>, %7, %cst_7 [1, 2] : vector<1x16x64xf32> to vector<1xf32>
    %9 = vector.shape_cast %8 : vector<1xf32> to vector<1x1x1xf32>
    %10 = vector.extract %9[0, 0, 0] : f32 from vector<1x1x1xf32>
    %cst_8 = arith.constant 1.600000e+01 : f32
    %11 = arith.divf %10, %cst_8 : f32
    %c0_9 = arith.constant 0 : index
    %c0_10 = arith.constant 0 : index
    %12 = memref.load %arg4[%c0_9, %c0_10] : memref<1x1xf32, #tpu.memory_space<smem>>
    memref.store %11, %arg4[%c0_9, %c0_10] : memref<1x1xf32, #tpu.memory_space<smem>>
    return
  }
}

</mosaic_0001>

<bundles_post_ra>
// kernel: tpu_custom_call.1
= control target key start
LH: loop header
LB: loop body
LE: loop exit
PB: predicated region body
PF: predicated region fallthrough
CT: control target
= control target key end

     0   :  { %10 = vsyncpa [#allocation3], 0  ;;  %vm35_vm0 = vcmask 261120   ;;  %s1200_s0 = inlined_call_operand.vmem [shape: f32[16,32], index: 0, kind: input, shape index: {}]   ;;  %s1201_s1 = inlined_call_operand.vmem [shape: f32[64,32], index: 1, kind: input, shape index: {}]   ;;  %s1202_s2 = inlined_call_operand.vmem [shape: f32[1,64], index: 2, kind: input, shape index: {}]   ;;  %s1203_s3 = inlined_call_operand.hbm [shape: f32[16,64], index: 3, kind: output, shape index: {0}]   ;;  %s1204_s4 = inlined_call_operand.hbm [shape: f32[1,1], index: 4, kind: output, shape index: {1}]  }
   0x1   :  { %v20_v0 = vld [vmem:[%s1201_s1] sm:$0xff]  ;;  %v21_v1 = vld [vmem:[%s1201_s1 + $0x8] sm:$0xff]  ;;  %v22_v2 = vld [vmem:[%s1201_s1 + $0x10] sm:$0xff] }
   0x2   :  { %v43_v3 = vsel %vm35_vm0, %v20_v0, 0  ;;  %v46_v4 = vsel %vm35_vm0, %v21_v1, 0  ;;  %v23_v5 = vld [vmem:[%s1201_s1 + $0x18] sm:$0xff]  ;;  %v49_v6 = vsel %vm35_vm0, %v22_v2, 0  ;;  %v24_v11 = vld [vmem:[%s1201_s1 + $0x20] sm:$0xff]  ;;  %v25_v12 = vld [vmem:[%s1201_s1 + $0x28] sm:$0xff] }
   0x3   :  { %v67_v7 = vand.u32 4294901760, %v43_v3  ;;  %v70_v8 = vand.u32 4294901760, %v46_v4  ;;  %v52_v9 = vsel %vm35_vm0, %v23_v5, 0  ;;  %v73_v10 = vand.u32 4294901760, %v49_v6  ;;  %v18_v14 = vld [vmem:[%s1200_s0] sm:$0xff] }
   0x4   :  { %v76_v13 = vand.u32 4294901760, %v52_v9  ;;  %v55_v17 = vsel %vm35_vm0, %v24_v11, 0  ;;  %v58_v18 = vsel %vm35_vm0, %v25_v12, 0  ;;  %v37_v19 = vsel %vm35_vm0, %v18_v14, 0 }
   0x5   :  { %v1074_v15 = vpack.c.bf16 %v70_v8, %v67_v7 }
   0x6   :  { %v1076_v16 = vpack.c.bf16 %v76_v13, %v73_v10 }
   0x7   :  { %11 = vsyncpa [#allocation4], 0  ;;  %871 = vmatprep.subr.bf16.mxu1 %v1074_v15  ;;  %919 = vmatprep.subr.bf16.mxu0 %v1074_v15  ;;  %v1083_v20 = vand.u32 4294901760, %v37_v19  ;;  %v79_v21 = vand.u32 4294901760, %v55_v17  ;;  %v82_v22 = vand.u32 4294901760, %v58_v18  ;;  %v26_v23 = vld [vmem:[%s1201_s1 + $0x30] sm:$0xff]  ;;  %v1104_v31 = vsub.f32 %v43_v3, %v67_v7 }
   0x8   :  { %873 = vmatpush3.bf16.xpose.msra.mxu1 %v1074_v15  ;;  %921 = vmatpush3.bf16.xpose.msra.mxu0 %v1074_v15  ;;  %v27_v24 = vld [vmem:[%s1201_s1 + $0x38] sm:$0xff]  ;;  %v61_v27 = vsel %vm35_vm0, %v26_v23, 0  ;;  %v1106_v32 = vsub.f32 %v46_v4, %v70_v8  ;;  %v19_v33 = vld [vmem:[%s1200_s0 + $0x8] sm:$0xff]  ;;  %v1124_v44 = vsub.f32 %v49_v6, %v73_v10  ;;  %v1126_v45 = vsub.f32 %v52_v9, %v76_v13  ;;  %s1020_s9 = smov [#allocation2]  }
   0x9   :  { %875 = vmatprep.subr.bf16.mxu1 %v1076_v16  ;;  %923 = vmatprep.subr.bf16.mxu0 %v1076_v16  ;;  %v1096_v25 = vsub.f32 %v37_v19, %v1083_v20  ;;  %v64_v28 = vsel %vm35_vm0, %v27_v24, 0  ;;  %v1101_v29 = vpack.c.bf16 %v82_v22, %v79_v21  ;;  %v85_v35 = vand.u32 4294901760, %v61_v27  ;;  %s671_s10 = sshll.u32 %s1020_s9, 4  ;;  %s672_s10 = int_to_ptr.vmem [resolvable:$true] %s671_s10 }
   0xa   :  { %v88_v36 = vand.u32 4294901760, %v64_v28  ;;  %v40_v37 = vsel %vm35_vm0, %v19_v33, 0  ;;  %v162_v38 = vand.u32 4294901760, %v1104_v31  ;;  %v169_v39 = vand.u32 4294901760, %v1106_v32  ;;  %s984_s11 = scalar_lea.vmem %s672_s10, 256  ;;  %p989_p1 = scmp.lt.s32.totalorder %s672_s10, %s672_s10 }
   0xb   :  { %v141_v26 = vand.u32 4294901760, %v1096_v25  ;;  %v1118_v40 = vand.u32 4294901760, %v40_v37  ;;  %v176_v49 = vand.u32 4294901760, %v1124_v44  ;;  %v183_v50 = vand.u32 4294901760, %v1126_v45  ;;  %p985_p0 = scmp.ne.s32.totalorder %s672_s10, %s984_s11  ;;  %p990_p2 = scmp.lt.s32.totalorder %s984_s11, %s984_s11 }
   0xc   :  { %v1120_v41 = vpack.c.bf16 %v88_v36, %v85_v35  ;;  %v163_v42 = vsub.f32 %v1104_v31, %v162_v38  ;;  %v170_v43 = vsub.f32 %v1106_v32, %v169_v39  ;;  %v1138_v52 = vsub.f32 %v55_v17, %v79_v21 }
   0xd   :  { %v142_v30 = vsub.f32 %v1096_v25, %v141_v26  ;;  %829 = vmatprep.mubr.f32.mxu0 %v141_v26  ;;  %v1129_v46 = vsub.f32 %v40_v37, %v1118_v40  ;;  %v1140_v53 = vsub.f32 %v58_v18, %v82_v22  ;;  %v934_v55 = vpack.c.bf16 %v169_v39, %v162_v38  ;;  %p991_p3 = por %p990_p2, %p989_p1 }
   0xe   :  { %v164_v47 = vand.u32 4294901760, %v163_v42  ;;  %v171_v48 = vand.u32 4294901760, %v170_v43  ;;  %v177_v56 = vsub.f32 %v1124_v44, %v176_v49  ;;  %v184_v57 = vsub.f32 %v1126_v45, %v183_v50 }
   0xf   :  { %v143_v34 = vand.u32 4294901760, %v142_v30  ;;  %v151_v51 = vand.u32 4294901760, %v1129_v46  ;;  %v190_v59 = vand.u32 4294901760, %v1138_v52  ;;  %v197_v62 = vand.u32 4294901760, %v1140_v53  ;;  %p992_p4 = pnand %p991_p3, %p985_p0 }
  0x10   :  { %877 = vmatpush3.bf16.xpose.msra.mxu1 %v1076_v16  ;;  %925 = vmatpush3.bf16.xpose.msra.mxu0 %v1076_v16  ;;  %v886_v54 = vpack.c.bf16 %v171_v48, %v164_v47  ;;  %v178_v60 = vand.u32 4294901760, %v177_v56  ;;  %v185_v61 = vand.u32 4294901760, %v184_v57  ;;  %v938_v0 = vpack.c.bf16 %v183_v50, %v176_v49 }
  0x11   :  { %879 = vmatprep.subr.bf16.mxu1 %v1101_v29  ;;  %927 = vmatprep.subr.bf16.mxu0 %v1101_v29  ;;  %v152_v58 = vsub.f32 %v1129_v46, %v151_v51  ;;  %v191_v1 = vsub.f32 %v1138_v52, %v190_v59  ;;  %v198_v3 = vsub.f32 %v1140_v53, %v197_v62  ;;  %vm646_vm1 = vcmask 523264  }
  0x12   :  { %772 = vmatprep.mubr.f32.mxu1 %v143_v34  ;;  %v890_v2 = vpack.c.bf16 %v185_v61, %v178_v60  ;;  %v203_v4 = vsub.f32 %v61_v27, %v85_v35  ;;  %v210_v5 = vsub.f32 %v64_v28, %v88_v36  ;;  %v942_v11 = vpack.c.bf16 %v197_v62, %v190_v59 }
  0x13   :  { %v153_v63 = vand.u32 4294901760, %v152_v58  ;;  %v192_v6 = vand.u32 4294901760, %v191_v1  ;;  %v199_v7 = vand.u32 4294901760, %v198_v3  ;;  %v902_v21 = vpack.c.bf16 %v1106_v32, %v1104_v31 }
  0x14   :  { %v204_v8 = vand.u32 4294901760, %v203_v4  ;;  %v211_v9 = vand.u32 4294901760, %v210_v5  ;;  %v906_v22 = vpack.c.bf16 %v1126_v45, %v1124_v44  ;;  %v910_v23 = vpack.c.bf16 %v1140_v53, %v1138_v52 }
  0x15   :  { %v894_v10 = vpack.c.bf16 %v199_v7, %v192_v6  ;;  %v914_v24 = vpack.c.bf16 %v210_v5, %v203_v4 }
  0x16   :  { %v205_v12 = vsub.f32 %v203_v4, %v204_v8  ;;  %v212_v13 = vsub.f32 %v210_v5, %v211_v9  ;;  %v946_v19 = vpack.c.bf16 %v211_v9, %v204_v8 }
  0x18   :  { %881 = vmatpush3.bf16.xpose.msra.mxu1 %v1101_v29  ;;  %929 = vmatpush3.bf16.xpose.msra.mxu0 %v1101_v29  ;;  %v206_v14 = vand.u32 4294901760, %v205_v12  ;;  %v213_v17 = vand.u32 4294901760, %v212_v13 }
  0x19   :  { %883 = vmatprep.subr.bf16.mxu1 %v1120_v41  ;;  %931 = vmatprep.subr.bf16.mxu0 %v1120_v41 }
  0x1a   :  { %v898_v18 = vpack.c.bf16 %v213_v17, %v206_v14 }
  0x20   :  { %885 = vmatpush3.bf16.xpose.msra.mxu1 %v1120_v41  ;;  %933 = vmatpush3.bf16.xpose.msra.mxu0 %v1120_v41 }
  0x21   :  { %887 = vmatprep.subr.bf16.mxu1 %v886_v54  ;;  %935 = vmatprep.subr.bf16.mxu0 %v934_v55 }
  0x27   :  { %773 = vmatmul.mubr.f32.vlgmr.msra.gmra.mrb[0].mxu1 %v153_v63  ;;  %830 = vmatmul.mubr.f32.vlgmr.msra.gmra.mrb[0].mxu0 %v151_v51 }
  0x28   :  { %889 = vmatpush3.bf16.xpose.msra.mxu1 %v886_v54  ;;  %937 = vmatpush3.bf16.xpose.msra.mxu0 %v934_v55 }
  0x29   :  { %891 = vmatprep.subr.bf16.mxu1 %v890_v2  ;;  %939 = vmatprep.subr.bf16.mxu0 %v938_v0 }
  0x2a   :  { %791 = vmatprep.mubr.f32.mxu1 %v1083_v20  ;;  %848 = vmatprep.mubr.f32.mxu0 %v1083_v20 }
  0x30   :  { %893 = vmatpush3.bf16.xpose.msra.mxu1 %v890_v2  ;;  %941 = vmatpush3.bf16.xpose.msra.mxu0 %v938_v0 }
  0x31   :  { %895 = vmatprep.subr.bf16.mxu1 %v894_v10  ;;  %943 = vmatprep.subr.bf16.mxu0 %v942_v11 }
  0x38   :  { %897 = vmatpush3.bf16.xpose.msra.mxu1 %v894_v10  ;;  %945 = vmatpush3.bf16.xpose.msra.mxu0 %v942_v11 }
  0x39   :  { %899 = vmatprep.subr.bf16.mxu1 %v898_v18  ;;  %947 = vmatprep.subr.bf16.mxu0 %v946_v19 }
  0x40   :  { %901 = vmatpush3.bf16.xpose.msra.mxu1 %v898_v18  ;;  %949 = vmatpush3.bf16.xpose.msra.mxu0 %v946_v19 }
  0x41   :  { %903 = vmatprep.subr.bf16.mxu1 %v902_v21  ;;  %951 = vmatprep.subr.bf16.mxu0 %v1074_v15 }
  0x47   :  { %792 = vmatmul.mubr.f32.vlgmr.msra.gmra.mrb[0].mxu1 %v1118_v40  ;;  %849 = vmatmul.mubr.f32.vlgmr.msra.gmra.mrb[0].mxu0 %v1118_v40 }
  0x48   :  { %905 = vmatpush3.bf16.xpose.msra.mxu1 %v902_v21  ;;  %953 = vmatpush3.bf16.xpose.msra.mxu0 %v1074_v15  ;;  %v695_v15 = vld [vmem:[%s1202_s2] ss:$0 sm:$0xff] }
  0x49   :  { %907 = vmatprep.subr.bf16.mxu1 %v906_v22  ;;  %955 = vmatprep.subr.bf16.mxu0 %v1076_v16 }
  0x4a   :  { %810 = vmatprep.mubr.f32.mxu1 %v1096_v25  ;;  %867 = vmatprep.mubr.f32.mxu0 %v1083_v20 }
  0x50   :  { %909 = vmatpush3.bf16.xpose.msra.mxu1 %v906_v22  ;;  %957 = vmatpush3.bf16.xpose.msra.mxu0 %v1076_v16 }
  0x51   :  { %911 = vmatprep.subr.bf16.mxu1 %v910_v23  ;;  %959 = vmatprep.subr.bf16.mxu0 %v1101_v29 }
  0x58   :  { %913 = vmatpush3.bf16.xpose.msra.mxu1 %v910_v23  ;;  %961 = vmatpush3.bf16.xpose.msra.mxu0 %v1101_v29 }
  0x59   :  { %915 = vmatprep.subr.bf16.mxu1 %v914_v24  ;;  %963 = vmatprep.subr.bf16.mxu0 %v1120_v41 }
  0x60   :  { %917 = vmatpush3.bf16.xpose.msra.mxu1 %v914_v24  ;;  %965 = vmatpush3.bf16.xpose.msra.mxu0 %v1120_v41 }
  0x67   :  { %811 = vmatmul.mubr.f32.vlgmr.msra.gmra.mrb[0].mxu1 %v1129_v46  ;;  %868 = vmatmul.mubr.f32.vlgmr.msra.gmra.mrb[0].mxu0 %v1118_v40 }
 0x13a   :  { %v812_v16 = vpop.f32.mrb[0].mxu1  ;;  %v869_v20 = vpop.f32.mrb[0].mxu0 }
 0x13b   :  { %v966_v25 = vadd.f32 %v812_v16, %v695_v15  ;;  %v360_v26 = vpop.f32.mrb[1].mxu1  ;;  %v636_v27 = vpop.f32.mrb[1].mxu0 }
 0x13c   :  { %v968_v28 = vadd.f32 %v695_v15, %v360_v26 }
 0x13d   :  { %v967_v29 = vadd.f32 %v966_v25, %v869_v20 }
 0x13e   :  { %v969_v30 = vadd.f32 %v968_v28, %v636_v27 }
 0x13f   :  { %648 = vst.msk [vmem:[#allocation2 + $0x8] sm:$0xff] %vm646_vm1, %v967_v29  ;;  %v650_v31 = vsel %vm646_vm1, %v967_v29, 0.0 }
 0x140   :  { %647 = vst.msk [vmem:[#allocation2] sm:$0xff] %vm646_vm1, %v969_v30  ;;  %v649_v32 = vsel %vm646_vm1, %v969_v30, 0.0 }
 0x141   :  { %v651_v33 = vadd.f32 %v650_v31, %v649_v32 }
 0x143   :  { %652 = vadd.xlane.f32.xlu0 %v651_v33 }
 0x144   :  { %995 = shalt.err (!%p992_p4)
}
 0x145   :  { %s996_s13 = scalar_lea.hbm %s1203_s3, 256 }
 0x146   :  { %p997_p5 = scmp.ne.s32.totalorder %s1203_s3, %s996_s13  ;;  %p1000_p6 = scmp.lt.u32.totalorder %s996_s13, %s1203_s3 }
 0x148   :  { %p1002_p7 = pnand %p1000_p6, %p997_p5 }
 0x14a   :  { %1005 = shalt.err (!%p1002_p7)
}
 0x14b   :  { %s1021_s18 = smov 128   ;;  %s1022_s19 = smov 8  }
 0x14c   :  { %677 = dma.vmem_to_hbm [thread:$0]  %s672_s10, 256, %s1203_s3, [#allocation3], %s1021_s18, %s1021_s18, %s1022_s19  }
 0x14d   :  { %s1006_s26 = scalar_lea.hbm %s1204_s4, 16 }
 0x14e   :  { %p1007_p8 = scmp.ne.s32.totalorder %s1204_s4, %s1006_s26  ;;  %p1010_p9 = scmp.lt.u32.totalorder %s1006_s26, %s1204_s4 }
 0x150   :  { %p1012_p10 = pnand %p1010_p9, %p1007_p8 }
 0x1d0   :  { %v653_v34 = vpop.xlane.xlu0 %652 }
 0x1d1   :  { %v654_v35 = vrot.slane %v653_v34, 4 }
 0x1d3   :  { %v655_v36 = vadd.f32 %v654_v35, %v653_v34 }
 0x1d5   :  { %v656_v37 = vrot.slane %v655_v36, 2 }
 0x1d7   :  { %v657_v38 = vadd.f32 %v656_v37, %v655_v36 }
 0x1d9   :  { %v658_v39 = vrot.slane %v657_v38, 1 }
 0x1db   :  { %v659_v40 = vadd.f32 %v658_v39, %v657_v38 }
 0x1dd   :  { %978 = vpush %v659_v40 }
 0x20e   :  { %s979_s22 = spop %978 }
 0x20f   :  { %s663_s23 = smul.f32 0.0625, %s979_s22 }
 0x211   :  { %665 = sst [smem:[#allocation5]] %s663_s23 }
 0x212   :  { %1015 = shalt.err (!%p1012_p10)
}
 0x213   :  { %s1023_s30 = smov [#allocation5]  }
 0x214   :  { %685 = dma.smem_to_hbm %s1023_s30, 16, %s1204_s4, [#allocation4]  }
 0x215   :  { %1016 = dma.done.wait [#allocation3], 256  }
 0x216   :  { %1017 = vsyncadd [#allocation3], 4294967040 }
 0x217   :  { %1018 = dma.done.wait [#allocation4], 16  }
 0x218   :  { %1019 = vsyncadd [#allocation4], 4294967280 }
 0x219   :  { %692 = sfence }
 0x21a   :  { %693 = vsyncpa [#allocation3], 1 }
 0x21b   :  { %694 = vsyncpa [#allocation4], 1 }

</bundles_post_ra>
